<compile_context>
chip_gen: v7x
topology: tpu7x:2x2x1
jax: 0.10.0
libtpu: 0.0.40
codegen_flags: <defaults>
</compile_context>

<pallas_src>
import functools

import jax
import jax.numpy as jnp
from jax.experimental import pallas as pl
from jax.experimental.pallas import tpu as pltpu

BN_EPS = 1e-5


def _round_up(x, m):
    return ((x + m - 1) // m) * m


def _fused_stack_kernel(*refs, flags, n_valid, bn_eps):
    """All layers in one kernel: y = relu(BN(x @ W)) chained, VMEM-resident."""
    x_ref = refs[0]
    o_ref = refs[-1]
    param_refs = refs[1:-1]           # (w, gamma, beta) per layer
    num_layers = len(flags)

    h = x_ref[...]                    # bf16 (N_pad, D0_pad)
    n_rows = h.shape[0]

    need_mask = n_valid != n_rows     # exclude padded rows from BN statistics
    if need_mask:
        row_ids = jax.lax.broadcasted_iota(jnp.int32, (n_rows, 1), 0)
        row_mask = (row_ids < n_valid).astype(jnp.float32)
        inv_n = jnp.float32(1.0 / n_valid)

    y = h.astype(jnp.float32)
    for l in range(num_layers):
        w_ref, g_ref, b_ref = param_refs[3 * l: 3 * l + 3]
        has_bn, has_act = flags[l]

        # bf16 operands -> MXU, f32 accumulation.
        lhs = h if h.dtype == jnp.bfloat16 else h.astype(jnp.bfloat16)
        y = jnp.dot(lhs, w_ref[...], preferred_element_type=jnp.float32)

        if has_bn:
            # BatchNorm1d training mode: biased batch stats over valid rows.
            if need_mask:
                mean = jnp.sum(y * row_mask, axis=0, keepdims=True) * inv_n
                var = jnp.sum(jnp.square(y - mean) * row_mask,
                              axis=0, keepdims=True) * inv_n
            else:
                mean = jnp.mean(y, axis=0, keepdims=True)
                var = jnp.mean(jnp.square(y - mean), axis=0, keepdims=True)
            y = (y - mean) * jax.lax.rsqrt(var + bn_eps)
            y = y * g_ref[...] + b_ref[...]
        else:
            y = y + b_ref[...]        # Linear bias (bias = not has_bn)

        if has_act:
            y = jnp.maximum(y, 0.0)   # nn.ReLU

        h = y                         # keep f32; cast to bf16 only at next dot

    o_ref[...] = y.astype(o_ref.dtype)


def init_general_multi_layer(key, num_layers, dim_in, dim_out, dim_inner=None,
                             final_act=True, has_bn=True):
    """Deterministic params mirroring GeneralMultiLayer.__init__ (pre-padded)."""
    dim_inner = dim_in if dim_inner is None else dim_inner
    params = []
    for i in range(num_layers):
        d_in = dim_in if i == 0 else dim_inner
        d_out = dim_out if i == num_layers - 1 else dim_inner
        has_act = final_act if i == num_layers - 1 else True
        d_in_pad = _round_up(d_in, 128)
        d_out_pad = _round_up(d_out, 128)

        key, kw, kg, kb = jax.random.split(key, 4)
        # Linear weight stored transposed: (d_in, d_out); zero-padded to 128s.
        w = (jax.random.normal(kw, (d_in, d_out), jnp.float32)
             * (1.0 / jnp.sqrt(jnp.float32(d_in))))
        w_pad = jnp.zeros((d_in_pad, d_out_pad), jnp.float32)
        w_pad = w_pad.at[:d_in, :d_out].set(w)

        gamma = jnp.ones((1, d_out_pad), jnp.float32)      # pad cols: gamma=1
        beta = jnp.zeros((1, d_out_pad), jnp.float32)      # pad cols: beta=0
        if has_bn:
            gamma = gamma.at[0, :d_out].set(
                1.0 + 0.1 * jax.random.normal(kg, (d_out,), jnp.float32))
        # beta doubles as the Linear bias when has_bn=False.
        beta = beta.at[0, :d_out].set(
            0.1 * jax.random.normal(kb, (d_out,), jnp.float32))

        params.append(dict(w_t=w_pad.astype(jnp.bfloat16),
                           gamma=gamma, beta=beta,
                           d_in=d_in, d_out=d_out,
                           has_bn=has_bn, has_act=has_act))
    return params


def general_multi_layer(x, params):
    """Forward pass: one fused pallas_call over the whole layer stack."""
    n, d_in = x.shape
    n_pad = _round_up(n, 16)                      # bf16 sublane packing
    d_in_pad = params[0]["w_t"].shape[0]
    d_last_pad = params[-1]["w_t"].shape[1]
    d_last = params[-1]["d_out"]

    x_pad = jnp.zeros((n_pad, d_in_pad), jnp.float32)
    x_pad = x_pad.at[:n, :d_in].set(x.astype(jnp.float32)).astype(jnp.bfloat16)

    flags = tuple((p["has_bn"], p["has_act"]) for p in params)
    kernel = functools.partial(_fused_stack_kernel, flags=flags,
                               n_valid=n, bn_eps=BN_EPS)

    in_specs = [pl.BlockSpec((n_pad, d_in_pad), lambda i: (0, 0))]
    inputs = [x_pad]
    for p in params:
        di, do = p["w_t"].shape
        in_specs.append(pl.BlockSpec((di, do), lambda i: (0, 0)))
        in_specs.append(pl.BlockSpec((1, do), lambda i: (0, 0)))
        in_specs.append(pl.BlockSpec((1, do), lambda i: (0, 0)))
        inputs += [p["w_t"], p["gamma"], p["beta"]]

    out = pl.pallas_call(
        kernel,
        out_shape=jax.ShapeDtypeStruct((n_pad, d_last_pad), jnp.float32),
        grid=(1,),
        in_specs=in_specs,
        out_specs=pl.BlockSpec((n_pad, d_last_pad), lambda i: (0, 0)),
        compiler_params=pltpu.CompilerParams(
            dimension_semantics=("arbitrary",)),
    )(*inputs)
    return out[:n, :d_last]


def _reference(x, params):
    """Pure-JAX reference with identical (bf16-matmul, f32-epilogue) math."""
    h = x.astype(jnp.bfloat16)
    y = None
    for p in params:
        d_in, d_out = p["d_in"], p["d_out"]
        w = p["w_t"][:d_in, :d_out]
        lhs = h if h.dtype == jnp.bfloat16 else h.astype(jnp.bfloat16)
        y = jnp.dot(lhs, w, preferred_element_type=jnp.float32)
        if p["has_bn"]:
            mean = jnp.mean(y, axis=0, keepdims=True)
            var = jnp.mean(jnp.square(y - mean), axis=0, keepdims=True)
            y = (y - mean) * jax.lax.rsqrt(var + BN_EPS)
            y = y * p["gamma"][:, :d_out] + p["beta"][:, :d_out]
        else:
            y = y + p["beta"][:, :d_out]
        if p["has_act"]:
            y = jnp.maximum(y, 0.0)
        h = y
    return y


if __name__ == "__main__":
    key = jax.random.PRNGKey(0)
    kx, kp = jax.random.split(key)

    # Small shapes: N=16 nodes, dim_in=32 -> dim_inner=32 -> dim_out=16, 3 layers.
    num_layers, dim_in, dim_out = 3, 32, 16
    x = jax.random.normal(kx, (16, dim_in), jnp.float32)

    params = init_general_multi_layer(kp, num_layers, dim_in, dim_out,
                                      dim_inner=None, final_act=True,
                                      has_bn=True)

    out = general_multi_layer(x, params)
    out = jax.block_until_ready(out)

    ref = _reference(x, params)
    assert out.shape == (16, dim_out), out.shape
    assert jnp.allclose(out, ref, atol=1e-2, rtol=1e-2), "mismatch vs reference"

    print("KERNEL_OK")
</pallas_src>

<mosaic_0001>
module attributes {stable_mosaic.version = 11 : i64} {
  func.func @_fused_stack_kernel(%arg0: i32, %arg1: memref<16x128xbf16, #tpu.memory_space<vmem>>, %arg2: memref<128x128xbf16, #tpu.memory_space<vmem>>, %arg3: memref<1x128xf32, #tpu.memory_space<vmem>>, %arg4: memref<1x128xf32, #tpu.memory_space<vmem>>, %arg5: memref<128x128xbf16, #tpu.memory_space<vmem>>, %arg6: memref<1x128xf32, #tpu.memory_space<vmem>>, %arg7: memref<1x128xf32, #tpu.memory_space<vmem>>, %arg8: memref<128x128xbf16, #tpu.memory_space<vmem>>, %arg9: memref<1x128xf32, #tpu.memory_space<vmem>>, %arg10: memref<1x128xf32, #tpu.memory_space<vmem>>, %arg11: memref<16x128xf32, #tpu.memory_space<vmem>>) attributes {dimension_semantics = [#tpu.dimension_semantics<arbitrary>], iteration_bounds = array<i64: 1>, scalar_prefetch = 0 : i64, scratch_operands = 0 : i64, tpu.core_type = #tpu.core_type<tc>, window_params = [{pipeline_mode = #tpu.pipeline_mode<synchronous>, transform_indices = @transform_0, window_bounds = array<i64: 16, 128>}, {pipeline_mode = #tpu.pipeline_mode<synchronous>, transform_indices = @transform_1, window_bounds = array<i64: 128, 128>}, {pipeline_mode = #tpu.pipeline_mode<synchronous>, transform_indices = @transform_2, window_bounds = array<i64: 1, 128>}, {pipeline_mode = #tpu.pipeline_mode<synchronous>, transform_indices = @transform_3, window_bounds = array<i64: 1, 128>}, {pipeline_mode = #tpu.pipeline_mode<synchronous>, transform_indices = @transform_4, window_bounds = array<i64: 128, 128>}, {pipeline_mode = #tpu.pipeline_mode<synchronous>, transform_indices = @transform_5, window_bounds = array<i64: 1, 128>}, {pipeline_mode = #tpu.pipeline_mode<synchronous>, transform_indices = @transform_6, window_bounds = array<i64: 1, 128>}, {pipeline_mode = #tpu.pipeline_mode<synchronous>, transform_indices = @transform_7, window_bounds = array<i64: 128, 128>}, {pipeline_mode = #tpu.pipeline_mode<synchronous>, transform_indices = @transform_8, window_bounds = array<i64: 1, 128>}, {pipeline_mode = #tpu.pipeline_mode<synchronous>, transform_indices = @transform_9, window_bounds = array<i64: 1, 128>}, {pipeline_mode = #tpu.pipeline_mode<synchronous>, transform_indices = @transform_10, window_bounds = array<i64: 16, 128>}]} {
    %c0 = arith.constant 0 : index
    %c0_0 = arith.constant 0 : index
    %0 = vector.load %arg1[%c0, %c0_0] : memref<16x128xbf16, #tpu.memory_space<vmem>>, vector<16x128xbf16>
    %c0_1 = arith.constant 0 : index
    %c0_2 = arith.constant 0 : index
    %1 = vector.load %arg2[%c0_1, %c0_2] : memref<128x128xbf16, #tpu.memory_space<vmem>>, vector<128x128xbf16>
    %cst = arith.constant dense<0.000000e+00> : vector<16x128xf32>
    %2 = tpu.matmul %0, %1, %cst {dimension_numbers = #tpu.dot_dimension_numbers<[1], [0], [0], [1], [0, 0, 1, 1], [], []>} : vector<16x128xbf16>, vector<128x128xbf16>, vector<16x128xf32> -> vector<16x128xf32>
    %cst_3 = arith.constant dense<0.000000e+00> : vector<128xf32>
    %3 = vector.multi_reduction <add>, %2, %cst_3 [0] : vector<16x128xf32> to vector<128xf32>
    %4 = vector.shape_cast %3 : vector<128xf32> to vector<1x128xf32>
    %cst_4 = arith.constant 1.600000e+01 : f32
    %5 = vector.broadcast %cst_4 : f32 to vector<1x128xf32>
    %6 = arith.divf %4, %5 : vector<1x128xf32>
    %7 = vector.broadcast %6 : vector<1x128xf32> to vector<16x128xf32>
    %8 = arith.subf %2, %7 : vector<16x128xf32>
    %9 = arith.mulf %8, %8 : vector<16x128xf32>
    %cst_5 = arith.constant dense<0.000000e+00> : vector<128xf32>
    %10 = vector.multi_reduction <add>, %9, %cst_5 [0] : vector<16x128xf32> to vector<128xf32>
    %11 = vector.shape_cast %10 : vector<128xf32> to vector<1x128xf32>
    %cst_6 = arith.constant 1.600000e+01 : f32
    %12 = vector.broadcast %cst_6 : f32 to vector<1x128xf32>
    %13 = arith.divf %11, %12 : vector<1x128xf32>
    %14 = vector.broadcast %6 : vector<1x128xf32> to vector<16x128xf32>
    %15 = arith.subf %2, %14 : vector<16x128xf32>
    %cst_7 = arith.constant 9.99999974E-6 : f32
    %16 = vector.broadcast %cst_7 : f32 to vector<1x128xf32>
    %17 = arith.addf %13, %16 : vector<1x128xf32>
    %18 = math.rsqrt %17 : vector<1x128xf32>
    %19 = vector.broadcast %18 : vector<1x128xf32> to vector<16x128xf32>
    %20 = arith.mulf %15, %19 : vector<16x128xf32>
    %c0_8 = arith.constant 0 : index
    %c0_9 = arith.constant 0 : index
    %21 = vector.load %arg3[%c0_8, %c0_9] : memref<1x128xf32, #tpu.memory_space<vmem>>, vector<1x128xf32>
    %22 = vector.broadcast %21 : vector<1x128xf32> to vector<16x128xf32>
    %23 = arith.mulf %20, %22 : vector<16x128xf32>
    %c0_10 = arith.constant 0 : index
    %c0_11 = arith.constant 0 : index
    %24 = vector.load %arg4[%c0_10, %c0_11] : memref<1x128xf32, #tpu.memory_space<vmem>>, vector<1x128xf32>
    %25 = vector.broadcast %24 : vector<1x128xf32> to vector<16x128xf32>
    %26 = arith.addf %23, %25 : vector<16x128xf32>
    %cst_12 = arith.constant 0.000000e+00 : f32
    %27 = vector.broadcast %cst_12 : f32 to vector<16x128xf32>
    %28 = arith.maximumf %26, %27 : vector<16x128xf32>
    %29 = arith.truncf %28 : vector<16x128xf32> to vector<16x128xbf16>
    %c0_13 = arith.constant 0 : index
    %c0_14 = arith.constant 0 : index
    %30 = vector.load %arg5[%c0_13, %c0_14] : memref<128x128xbf16, #tpu.memory_space<vmem>>, vector<128x128xbf16>
    %cst_15 = arith.constant dense<0.000000e+00> : vector<16x128xf32>
    %31 = tpu.matmul %29, %30, %cst_15 {dimension_numbers = #tpu.dot_dimension_numbers<[1], [0], [0], [1], [0, 0, 1, 1], [], []>} : vector<16x128xbf16>, vector<128x128xbf16>, vector<16x128xf32> -> vector<16x128xf32>
    %cst_16 = arith.constant dense<0.000000e+00> : vector<128xf32>
    %32 = vector.multi_reduction <add>, %31, %cst_16 [0] : vector<16x128xf32> to vector<128xf32>
    %33 = vector.shape_cast %32 : vector<128xf32> to vector<1x128xf32>
    %cst_17 = arith.constant 1.600000e+01 : f32
    %34 = vector.broadcast %cst_17 : f32 to vector<1x128xf32>
    %35 = arith.divf %33, %34 : vector<1x128xf32>
    %36 = vector.broadcast %35 : vector<1x128xf32> to vector<16x128xf32>
    %37 = arith.subf %31, %36 : vector<16x128xf32>
    %38 = arith.mulf %37, %37 : vector<16x128xf32>
    %cst_18 = arith.constant dense<0.000000e+00> : vector<128xf32>
    %39 = vector.multi_reduction <add>, %38, %cst_18 [0] : vector<16x128xf32> to vector<128xf32>
    %40 = vector.shape_cast %39 : vector<128xf32> to vector<1x128xf32>
    %cst_19 = arith.constant 1.600000e+01 : f32
    %41 = vector.broadcast %cst_19 : f32 to vector<1x128xf32>
    %42 = arith.divf %40, %41 : vector<1x128xf32>
    %43 = vector.broadcast %35 : vector<1x128xf32> to vector<16x128xf32>
    %44 = arith.subf %31, %43 : vector<16x128xf32>
    %cst_20 = arith.constant 9.99999974E-6 : f32
    %45 = vector.broadcast %cst_20 : f32 to vector<1x128xf32>
    %46 = arith.addf %42, %45 : vector<1x128xf32>
    %47 = math.rsqrt %46 : vector<1x128xf32>
    %48 = vector.broadcast %47 : vector<1x128xf32> to vector<16x128xf32>
    %49 = arith.mulf %44, %48 : vector<16x128xf32>
    %c0_21 = arith.constant 0 : index
    %c0_22 = arith.constant 0 : index
    %50 = vector.load %arg6[%c0_21, %c0_22] : memref<1x128xf32, #tpu.memory_space<vmem>>, vector<1x128xf32>
    %51 = vector.broadcast %50 : vector<1x128xf32> to vector<16x128xf32>
    %52 = arith.mulf %49, %51 : vector<16x128xf32>
    %c0_23 = arith.constant 0 : index
    %c0_24 = arith.constant 0 : index
    %53 = vector.load %arg7[%c0_23, %c0_24] : memref<1x128xf32, #tpu.memory_space<vmem>>, vector<1x128xf32>
    %54 = vector.broadcast %53 : vector<1x128xf32> to vector<16x128xf32>
    %55 = arith.addf %52, %54 : vector<16x128xf32>
    %cst_25 = arith.constant 0.000000e+00 : f32
    %56 = vector.broadcast %cst_25 : f32 to vector<16x128xf32>
    %57 = arith.maximumf %55, %56 : vector<16x128xf32>
    %58 = arith.truncf %57 : vector<16x128xf32> to vector<16x128xbf16>
    %c0_26 = arith.constant 0 : index
    %c0_27 = arith.constant 0 : index
    %59 = vector.load %arg8[%c0_26, %c0_27] : memref<128x128xbf16, #tpu.memory_space<vmem>>, vector<128x128xbf16>
    %cst_28 = arith.constant dense<0.000000e+00> : vector<16x128xf32>
    %60 = tpu.matmul %58, %59, %cst_28 {dimension_numbers = #tpu.dot_dimension_numbers<[1], [0], [0], [1], [0, 0, 1, 1], [], []>} : vector<16x128xbf16>, vector<128x128xbf16>, vector<16x128xf32> -> vector<16x128xf32>
    %cst_29 = arith.constant dense<0.000000e+00> : vector<128xf32>
    %61 = vector.multi_reduction <add>, %60, %cst_29 [0] : vector<16x128xf32> to vector<128xf32>
    %62 = vector.shape_cast %61 : vector<128xf32> to vector<1x128xf32>
    %cst_30 = arith.constant 1.600000e+01 : f32
    %63 = vector.broadcast %cst_30 : f32 to vector<1x128xf32>
    %64 = arith.divf %62, %63 : vector<1x128xf32>
    %65 = vector.broadcast %64 : vector<1x128xf32> to vector<16x128xf32>
    %66 = arith.subf %60, %65 : vector<16x128xf32>
    %67 = arith.mulf %66, %66 : vector<16x128xf32>
    %cst_31 = arith.constant dense<0.000000e+00> : vector<128xf32>
    %68 = vector.multi_reduction <add>, %67, %cst_31 [0] : vector<16x128xf32> to vector<128xf32>
    %69 = vector.shape_cast %68 : vector<128xf32> to vector<1x128xf32>
    %cst_32 = arith.constant 1.600000e+01 : f32
    %70 = vector.broadcast %cst_32 : f32 to vector<1x128xf32>
    %71 = arith.divf %69, %70 : vector<1x128xf32>
    %72 = vector.broadcast %64 : vector<1x128xf32> to vector<16x128xf32>
    %73 = arith.subf %60, %72 : vector<16x128xf32>
    %cst_33 = arith.constant 9.99999974E-6 : f32
    %74 = vector.broadcast %cst_33 : f32 to vector<1x128xf32>
    %75 = arith.addf %71, %74 : vector<1x128xf32>
    %76 = math.rsqrt %75 : vector<1x128xf32>
    %77 = vector.broadcast %76 : vector<1x128xf32> to vector<16x128xf32>
    %78 = arith.mulf %73, %77 : vector<16x128xf32>
    %c0_34 = arith.constant 0 : index
    %c0_35 = arith.constant 0 : index
    %79 = vector.load %arg9[%c0_34, %c0_35] : memref<1x128xf32, #tpu.memory_space<vmem>>, vector<1x128xf32>
    %80 = vector.broadcast %79 : vector<1x128xf32> to vector<16x128xf32>
    %81 = arith.mulf %78, %80 : vector<16x128xf32>
    %c0_36 = arith.constant 0 : index
    %c0_37 = arith.constant 0 : index
    %82 = vector.load %arg10[%c0_36, %c0_37] : memref<1x128xf32, #tpu.memory_space<vmem>>, vector<1x128xf32>
    %83 = vector.broadcast %82 : vector<1x128xf32> to vector<16x128xf32>
    %84 = arith.addf %81, %83 : vector<16x128xf32>
    %cst_38 = arith.constant 0.000000e+00 : f32
    %85 = vector.broadcast %cst_38 : f32 to vector<16x128xf32>
    %86 = arith.maximumf %84, %85 : vector<16x128xf32>
    %c0_39 = arith.constant 0 : index
    %c0_40 = arith.constant 0 : index
    %87 = vector.load %arg11[%c0_39, %c0_40] : memref<16x128xf32, #tpu.memory_space<vmem>>, vector<16x128xf32>
    tpu.vector_store %arg11[%c0_39, %c0_40], %86 {strides = array<i32>} : memref<16x128xf32, #tpu.memory_space<vmem>>, vector<16x128xf32>,
    return
  }
  func.func @transform_0(%arg0: i32) -> (i32, i32) {
    %c0_i32 = arith.constant 0 : i32
    %c0_i32_0 = arith.constant 0 : i32
    %c0_i32_1 = arith.constant 0 : i32
    return %c0_i32, %c0_i32_0 : i32, i32
  }
  func.func @transform_1(%arg0: i32) -> (i32, i32) {
    %c0_i32 = arith.constant 0 : i32
    %c0_i32_0 = arith.constant 0 : i32
    %c0_i32_1 = arith.constant 0 : i32
    return %c0_i32, %c0_i32_0 : i32, i32
  }
  func.func @transform_2(%arg0: i32) -> (i32, i32) {
    %c0_i32 = arith.constant 0 : i32
    %c0_i32_0 = arith.constant 0 : i32
    %c0_i32_1 = arith.constant 0 : i32
    return %c0_i32, %c0_i32_0 : i32, i32
  }
  func.func @transform_3(%arg0: i32) -> (i32, i32) {
    %c0_i32 = arith.constant 0 : i32
    %c0_i32_0 = arith.constant 0 : i32
    %c0_i32_1 = arith.constant 0 : i32
    return %c0_i32, %c0_i32_0 : i32, i32
  }
  func.func @transform_4(%arg0: i32) -> (i32, i32) {
    %c0_i32 = arith.constant 0 : i32
    %c0_i32_0 = arith.constant 0 : i32
    %c0_i32_1 = arith.constant 0 : i32
    return %c0_i32, %c0_i32_0 : i32, i32
  }
  func.func @transform_5(%arg0: i32) -> (i32, i32) {
    %c0_i32 = arith.constant 0 : i32
    %c0_i32_0 = arith.constant 0 : i32
    %c0_i32_1 = arith.constant 0 : i32
    return %c0_i32, %c0_i32_0 : i32, i32
  }
  func.func @transform_6(%arg0: i32) -> (i32, i32) {
    %c0_i32 = arith.constant 0 : i32
    %c0_i32_0 = arith.constant 0 : i32
    %c0_i32_1 = arith.constant 0 : i32
    return %c0_i32, %c0_i32_0 : i32, i32
  }
  func.func @transform_7(%arg0: i32) -> (i32, i32) {
    %c0_i32 = arith.constant 0 : i32
    %c0_i32_0 = arith.constant 0 : i32
    %c0_i32_1 = arith.constant 0 : i32
    return %c0_i32, %c0_i32_0 : i32, i32
  }
  func.func @transform_8(%arg0: i32) -> (i32, i32) {
    %c0_i32 = arith.constant 0 : i32
    %c0_i32_0 = arith.constant 0 : i32
    %c0_i32_1 = arith.constant 0 : i32
    return %c0_i32, %c0_i32_0 : i32, i32
  }
  func.func @transform_9(%arg0: i32) -> (i32, i32) {
    %c0_i32 = arith.constant 0 : i32
    %c0_i32_0 = arith.constant 0 : i32
    %c0_i32_1 = arith.constant 0 : i32
    return %c0_i32, %c0_i32_0 : i32, i32
  }
  func.func @transform_10(%arg0: i32) -> (i32, i32) {
    %c0_i32 = arith.constant 0 : i32
    %c0_i32_0 = arith.constant 0 : i32
    %c0_i32_1 = arith.constant 0 : i32
    return %c0_i32, %c0_i32_0 : i32, i32
  }
}

</mosaic_0001>

<bundles_post_ra>
// kernel: tpu_custom_call.1
= control target key start
LH: loop header
LB: loop body
LE: loop exit
PB: predicated region body
PF: predicated region fallthrough
CT: control target
= control target key end

     0   :  { %15 = vsyncpa [#allocation3], 0  ;;  %s1049_s0 = inlined_call_operand.hbm [shape: bf16[16,128], index: 0, kind: input, shape index: {}]   ;;  %s1050_s1 = inlined_call_operand.hbm [shape: bf16[128,128], index: 1, kind: input, shape index: {}]   ;;  %s1051_s2 = inlined_call_operand.vmem [shape: f32[1,128], index: 2, kind: input, shape index: {}]   ;;  %s1052_s3 = inlined_call_operand.vmem [shape: f32[1,128], index: 3, kind: input, shape index: {}]   ;;  %s1053_s4 = inlined_call_operand.hbm [shape: bf16[128,128], index: 4, kind: input, shape index: {}]   ;;  %s1054_s5 = inlined_call_operand.vmem [shape: f32[1,128], index: 5, kind: input, shape index: {}]   ;;  %s1055_s6 = inlined_call_operand.vmem [shape: f32[1,128], index: 6, kind: input, shape index: {}]   ;;  %s1056_s7 = inlined_call_operand.hbm [shape: bf16[128,128], index: 7, kind: input, shape index: {}]   ;;  %s1057_s8 = inlined_call_operand.vmem [shape: f32[1,128], index: 8, kind: input, shape index: {}]   ;;  %s1058_s9 = inlined_call_operand.vmem [shape: f32[1,128], index: 9, kind: input, shape index: {}]   ;;  %s1059_s10 = inlined_call_operand.hbm [shape: f32[16,128], index: 10, kind: output, shape index: {}]  }
   0x1   :  { %16 = vsyncpa [#allocation6], 0 }
   0x2   :  { %17 = vsyncpa [#allocation9], 0 }
   0x3   :  { %18 = vsyncpa [#allocation4], 0  ;;  %s849_s13 = smov [#allocation5]   ;;  %s850_s15 = smov [#allocation2]  }
   0x4   :  { %s36_s14 = sshll.u32 %s849_s13, 4  ;;  %s24_s16 = sshll.u32 %s850_s15, 4  ;;  %s37_s14 = int_to_ptr.vmem [resolvable:$true] %s36_s14  ;;  %s915_s16 = int_to_ptr.vmem [resolvable:$true] %s24_s16 }
   0x5   :  { %s731_s19 = scalar_lea.hbm %s1050_s1, 1024 }
   0x6   :  { %p732_p0 = scmp.ne.s32.totalorder %s1050_s1, %s731_s19  ;;  %p735_p1 = scmp.lt.u32.totalorder %s731_s19, %s1050_s1 }
   0x8   :  { %p737_p2 = pnand %p735_p1, %p732_p0 }
   0xa   :  { %740 = shalt.err (!%p737_p2)
}
   0xb   :  { %s741_s24 = scalar_lea.vmem %s37_s14, 1024  ;;  %p746_p4 = scmp.lt.s32.totalorder %s37_s14, %s37_s14 }
   0xc   :  { %p742_p3 = scmp.ne.s32.totalorder %s37_s14, %s741_s24  ;;  %p747_p5 = scmp.lt.s32.totalorder %s741_s24, %s741_s24 }
   0xe   :  { %p748_p6 = por %p747_p5, %p746_p4 }
  0x10   :  { %p749_p7 = pnand %p748_p6, %p742_p3 }
  0x12   :  { %752 = shalt.err (!%p749_p7)
}
  0x13   :  { %s851_s25 = smov 64   ;;  %s852_s26 = smov 4  }
  0x14   :  { %42 = dma.hbm_to_vmem [thread:$0]  %s1050_s1, 1024, %s37_s14, [#allocation6], %s851_s25, %s851_s25, %s852_s26  }
  0x15   :  { %s753_s11 = scalar_lea.hbm %s1049_s0, 128 }
  0x16   :  { %p754_p8 = scmp.ne.s32.totalorder %s1049_s0, %s753_s11  ;;  %p757_p9 = scmp.lt.u32.totalorder %s753_s11, %s1049_s0 }
  0x18   :  { %p759_p10 = pnand %p757_p9, %p754_p8 }
  0x1a   :  { %762 = shalt.err (!%p759_p10)
}
  0x1b   :  { %s763_s18 = scalar_lea.vmem %s915_s16, 128  ;;  %p768_p12 = scmp.lt.s32.totalorder %s915_s16, %s915_s16 }
  0x1c   :  { %p764_p11 = scmp.ne.s32.totalorder %s915_s16, %s763_s18  ;;  %p769_p13 = scmp.lt.s32.totalorder %s763_s18, %s763_s18 }
  0x1e   :  { %p770_p0 = por %p769_p13, %p768_p12 }
  0x20   :  { %p771_p1 = pnand %p770_p0, %p764_p11 }
  0x22   :  { %774 = shalt.err (!%p771_p1)
}
  0x23   :  { %30 = dma.hbm_to_vmem [thread:$0]  %s1049_s0, 128, %s915_s16, [#allocation3], %s851_s25, %s851_s25, %s852_s26  }
  0x24   :  { %s853_s19 = smov [#allocation7]   ;;  %s854_s21 = smov [#allocation8]  }
  0x25   :  { %s52_s20 = sshll.u32 %s853_s19, 4  ;;  %s68_s22 = sshll.u32 %s854_s21, 4  ;;  %s53_s20 = int_to_ptr.vmem [resolvable:$true] %s52_s20  ;;  %s952_s22 = int_to_ptr.vmem [resolvable:$true] %s68_s22 }
  0x26   :  { %s775_s27 = scalar_lea.hbm %s1053_s4, 1024 }
  0x27   :  { %p776_p2 = scmp.ne.s32.totalorder %s1053_s4, %s775_s27  ;;  %p779_p3 = scmp.lt.u32.totalorder %s775_s27, %s1053_s4 }
  0x29   :  { %p781_p4 = pnand %p779_p3, %p776_p2 }
  0x2b   :  { %784 = shalt.err (!%p781_p4)
}
  0x2c   :  { %s785_s0 = scalar_lea.vmem %s53_s20, 1024  ;;  %p790_p6 = scmp.lt.s32.totalorder %s53_s20, %s53_s20 }
  0x2d   :  { %p786_p5 = scmp.ne.s32.totalorder %s53_s20, %s785_s0  ;;  %p791_p7 = scmp.lt.s32.totalorder %s785_s0, %s785_s0 }
  0x2f   :  { %p792_p8 = por %p791_p7, %p790_p6 }
  0x31   :  { %p793_p9 = pnand %p792_p8, %p786_p5 }
  0x33   :  { %796 = shalt.err (!%p793_p9)
}
  0x34   :  { %58 = dma.hbm_to_vmem [thread:$0]  %s1053_s4, 1024, %s53_s20, [#allocation6], %s851_s25, %s851_s25, %s852_s26  }
  0x35   :  { %s797_s17 = scalar_lea.hbm %s1056_s7, 1024 }
  0x36   :  { %p798_p10 = scmp.ne.s32.totalorder %s1056_s7, %s797_s17  ;;  %p801_p11 = scmp.lt.u32.totalorder %s797_s17, %s1056_s7 }
  0x38   :  { %p803_p12 = pnand %p801_p11, %p798_p10 }
  0x3a   :  { %806 = shalt.err (!%p803_p12)
}
  0x3b   :  { %s807_s21 = scalar_lea.vmem %s952_s22, 1024  ;;  %p812_p0 = scmp.lt.s32.totalorder %s952_s22, %s952_s22 }
  0x3c   :  { %p808_p13 = scmp.ne.s32.totalorder %s952_s22, %s807_s21  ;;  %p813_p1 = scmp.lt.s32.totalorder %s807_s21, %s807_s21 }
  0x3e   :  { %p814_p2 = por %p813_p1, %p812_p0 }
  0x40   :  { %p815_p3 = pnand %p814_p2, %p808_p13 }
  0x42   :  { %818 = shalt.err (!%p815_p3)
}
  0x43   :  { %74 = dma.hbm_to_vmem [thread:$0]  %s1056_s7, 1024, %s952_s22, [#allocation9], %s851_s25, %s851_s25, %s852_s26  }
  0x44   :  { %841 = dma.done.wait [#allocation3], 128  }
  0x45   :  { %842 = vsyncadd [#allocation3], 4294967168 }
  0x46   :  { %843 = dma.done.wait [#allocation6], 2048  }
  0x47   :  { %844 = vsyncadd [#allocation6], 4294965248 }
  0x48   :  { %845 = dma.done.wait [#allocation9], 1024  }
  0x49   :  { %846 = vsyncadd [#allocation9], 4294966272  ;;  %v855_v0 = vmov 0.0   ;;  %vm856_vm0 = vmmov 0   ;;  %v700_v1 = vld [vmem:[#allocation5] sm:$0xff]   ;;  %v701_v2 = vld [vmem:[#allocation5 + $0x8] sm:$0xff]  }
  0x4a   :  { %629 = vmatprep.subr.bf16.mxu0 %v855_v0  ;;  %645 = vmatprep.mubr.msk.bf16.mxu0 %vm856_vm0, %v855_v0  ;;  %v702_v3 = vld [vmem:[#allocation5 + $0x10] sm:$0xff]   ;;  %v703_v4 = vld [vmem:[#allocation5 + $0x18] sm:$0xff]   ;;  %v704_v5 = vld [vmem:[#allocation5 + $0x20] sm:$0xff]   ;;  %s857_s29 = smov [#allocation10]  }
  0x4b   :  { %649 = vmatprep.subr.bf16.mxu1 %v855_v0  ;;  %665 = vmatprep.mubr.msk.bf16.mxu1 %vm856_vm0, %v855_v0  ;;  %v705_v6 = vld [vmem:[#allocation5 + $0x28] sm:$0xff]   ;;  %v706_v7 = vld [vmem:[#allocation5 + $0x30] sm:$0xff]   ;;  %v707_v8 = vld [vmem:[#allocation5 + $0x38] sm:$0xff]   ;;  %s557_s30 = sshll.u32 %s857_s29, 4  ;;  %s558_s30 = int_to_ptr.vmem [resolvable:$true] %s557_s30 }
  0x4c   :  { %630 = vmatpush3.bf16.msra.mxu0 %v700_v1  ;;  %v708_v9 = vld [vmem:[#allocation2] sm:$0xff]   ;;  %v709_v10 = vld [vmem:[#allocation7] sm:$0xff]   ;;  %v710_v11 = vld [vmem:[#allocation7 + $0x8] sm:$0xff]   ;;  %s819_s11 = scalar_lea.vmem %s558_s30, 256  ;;  %p824_p5 = scmp.lt.s32.totalorder %s558_s30, %s558_s30 }
  0x4d   :  { %631 = vmatprep.subr.bf16.mxu0 %v855_v0  ;;  %650 = vmatpush3.bf16.msra.mxu1 %v709_v10  ;;  %v711_v12 = vld [vmem:[#allocation7 + $0x10] sm:$0xff]   ;;  %v712_v13 = vld [vmem:[#allocation7 + $0x18] sm:$0xff]   ;;  %v713_v14 = vld [vmem:[#allocation7 + $0x20] sm:$0xff]   ;;  %p820_p4 = scmp.ne.s32.totalorder %s558_s30, %s819_s11  ;;  %p825_p6 = scmp.lt.s32.totalorder %s819_s11, %s819_s11 }
  0x4e   :  { %651 = vmatprep.subr.bf16.mxu1 %v855_v0  ;;  %v714_v15 = vld [vmem:[#allocation7 + $0x28] sm:$0xff]   ;;  %v715_v16 = vld [vmem:[#allocation7 + $0x30] sm:$0xff]   ;;  %v716_v17 = vld [vmem:[#allocation7 + $0x38] sm:$0xff]  }
  0x4f   :  { %v580_v44 = vld [vmem:[%s1051_s2] ss:$0 sm:$0xff]  ;;  %v717_v55 = vld [vmem:[#allocation8] sm:$0xff]   ;;  %v718_v56 = vld [vmem:[#allocation8 + $0x8] sm:$0xff]   ;;  %p826_p7 = por %p825_p6, %p824_p5 }
  0x50   :  { %632 = vmatpush3.bf16.msra.mxu0 %v701_v2  ;;  %v581_v47 = vld [vmem:[%s1052_s3] ss:$0 sm:$0xff]  ;;  %v719_v57 = vld [vmem:[#allocation8 + $0x10] sm:$0xff]   ;;  %v721_v59 = vld [vmem:[#allocation8 + $0x20] sm:$0xff]  }
  0x51   :  { %633 = vmatprep.subr.bf16.mxu0 %v855_v0  ;;  %652 = vmatpush3.bf16.msra.mxu1 %v710_v11  ;;  %v720_v58 = vld [vmem:[#allocation8 + $0x18] sm:$0xff]   ;;  %v722_v60 = vld [vmem:[#allocation8 + $0x28] sm:$0xff]   ;;  %v723_v61 = vld [vmem:[#allocation8 + $0x30] sm:$0xff]   ;;  %p827_p8 = pnand %p826_p7, %p820_p4 }
  0x52   :  { %653 = vmatprep.subr.bf16.mxu1 %v855_v0  ;;  %v724_v62 = vld [vmem:[#allocation8 + $0x38] sm:$0xff]  }
  0x54   :  { %634 = vmatpush3.bf16.msra.mxu0 %v702_v3 }
  0x55   :  { %635 = vmatprep.subr.bf16.mxu0 %v855_v0  ;;  %654 = vmatpush3.bf16.msra.mxu1 %v711_v12 }
  0x56   :  { %655 = vmatprep.subr.bf16.mxu1 %v855_v0 }
  0x58   :  { %636 = vmatpush3.bf16.msra.mxu0 %v703_v4 }
  0x59   :  { %637 = vmatprep.subr.bf16.mxu0 %v855_v0  ;;  %656 = vmatpush3.bf16.msra.mxu1 %v712_v13 }
  0x5a   :  { %657 = vmatprep.subr.bf16.mxu1 %v855_v0 }
  0x5c   :  { %638 = vmatpush3.bf16.msra.mxu0 %v704_v5 }
  0x5d   :  { %639 = vmatprep.subr.bf16.mxu0 %v855_v0  ;;  %658 = vmatpush3.bf16.msra.mxu1 %v713_v14 }
  0x5e   :  { %659 = vmatprep.subr.bf16.mxu1 %v855_v0 }
  0x60   :  { %640 = vmatpush3.bf16.msra.mxu0 %v705_v6 }
  0x61   :  { %641 = vmatprep.subr.bf16.mxu0 %v855_v0  ;;  %660 = vmatpush3.bf16.msra.mxu1 %v714_v15 }
  0x62   :  { %661 = vmatprep.subr.bf16.mxu1 %v855_v0 }
  0x64   :  { %642 = vmatpush3.bf16.msra.mxu0 %v706_v7 }
  0x65   :  { %643 = vmatprep.subr.bf16.mxu0 %v855_v0  ;;  %662 = vmatpush3.bf16.msra.mxu1 %v715_v16 }
  0x66   :  { %663 = vmatprep.subr.bf16.mxu1 %v855_v0 }
  0x68   :  { %644 = vmatpush3.bf16.msra.mxu0 %v707_v8 }
  0x69   :  { %669 = vmatprep.subr.bf16.mxu0 %v855_v0  ;;  %664 = vmatpush3.bf16.msra.mxu1 %v716_v17 }
  0x6b   :  { %646 = vmatmul.mubr.bf16.vlgmr.msra.gmra.mrb[0].mxu0 %v708_v9 }
  0x6c   :  { %685 = vmatprep.mubr.msk.bf16.mxu0 %vm856_vm0, %v855_v0  ;;  %670 = vmatpush3.bf16.msra.mxu0 %v717_v55 }
  0x6d   :  { %671 = vmatprep.subr.bf16.mxu0 %v855_v0 }
  0x70   :  { %672 = vmatpush3.bf16.msra.mxu0 %v718_v56 }
  0x71   :  { %673 = vmatprep.subr.bf16.mxu0 %v855_v0 }
  0x74   :  { %674 = vmatpush3.bf16.msra.mxu0 %v719_v57 }
  0x75   :  { %675 = vmatprep.subr.bf16.mxu0 %v855_v0 }
  0x78   :  { %676 = vmatpush3.bf16.msra.mxu0 %v720_v58 }
  0x79   :  { %677 = vmatprep.subr.bf16.mxu0 %v855_v0 }
  0x7c   :  { %678 = vmatpush3.bf16.msra.mxu0 %v721_v59 }
  0x7d   :  { %679 = vmatprep.subr.bf16.mxu0 %v855_v0 }
  0x80   :  { %680 = vmatpush3.bf16.msra.mxu0 %v722_v60 }
  0x81   :  { %681 = vmatprep.subr.bf16.mxu0 %v855_v0 }
  0x84   :  { %682 = vmatpush3.bf16.msra.mxu0 %v723_v61 }
  0x85   :  { %683 = vmatprep.subr.bf16.mxu0 %v855_v0 }
  0x88   :  { %684 = vmatpush3.bf16.msra.mxu0 %v724_v62  ;;  %v600_v62 = vld [vmem:[%s1057_s8] ss:$0 sm:$0xff] }
 0x13e   :  { %v198_v18 = vpop.f32.mrb[0].mxu0 }
 0x13f   :  { %v647_v19 = vpop.f32.mrb[1].mxu0 }
 0x140   :  { %v201_v20 = vpop.f32.mrb[2].mxu0 }
 0x141   :  { %v205_v21 = vadd.f32 %v201_v20, %v198_v18  ;;  %v648_v22 = vpop.f32.mrb[3].mxu0 }
 0x143   :  { %v206_v23 = vrot.slane %v205_v21, 4 }
 0x145   :  { %v207_v24 = vadd.f32 %v206_v23, %v205_v21 }
 0x147   :  { %v208_v25 = vrot.slane %v207_v24, 2 }
 0x149   :  { %v209_v26 = vadd.f32 %v208_v25, %v207_v24  ;;  %v590_v25 = vld [vmem:[%s1054_s5] ss:$0 sm:$0xff] }
 0x14b   :  { %v210_v27 = vrot.slane %v209_v26, 1 }
 0x14d   :  { %v211_v28 = vadd.f32 %v210_v27, %v209_v26 }
 0x14f   :  { %v213_v29 = vmul.f32 0.0625, %v211_v28  ;;  %v591_v28 = vld [vmem:[%s1055_s6] ss:$0 sm:$0xff] }
 0x151   :  { %v214_v30 = vsub.f32 %v198_v18, %v213_v29  ;;  %v215_v31 = vsub.f32 %v201_v20, %v213_v29 }
 0x153   :  { %v216_v32 = vmul.f32 %v214_v30, %v214_v30  ;;  %v217_v33 = vmul.f32 %v215_v31, %v215_v31 }
 0x155   :  { %v218_v34 = vadd.f32 %v217_v33, %v216_v32 }
 0x157   :  { %v219_v35 = vrot.slane %v218_v34, 4 }
 0x159   :  { %v220_v36 = vadd.f32 %v219_v35, %v218_v34 }
 0x15b   :  { %v221_v37 = vrot.slane %v220_v36, 2 }
 0x15d   :  { %v222_v38 = vadd.f32 %v221_v37, %v220_v36 }
 0x15f   :  { %v223_v39 = vrot.slane %v222_v38, 1 }
 0x161   :  { %v224_v40 = vadd.f32 %v223_v39, %v222_v38 }
 0x163   :  { %v225_v41 = vmul.f32 0.0625, %v224_v40 }
 0x165   :  { %v226_v42 = vadd.f32 1e-05, %v225_v41 }
 0x167   :  { %725 = vrsqrt.f32 %v226_v42 }
 0x171   :  { %v726_v43 = vpop.eup %725 }
 0x172   :  { %v228_v45 = vmul.f32 %v726_v43, %v214_v30  ;;  %v229_v46 = vmul.f32 %v726_v43, %v215_v31 }
 0x174   :  { %v237_v48 = vmul.f32 %v580_v44, %v228_v45  ;;  %v238_v49 = vmul.f32 %v580_v44, %v229_v46 }
 0x176   :  { %v246_v50 = vadd.f32 %v581_v47, %v237_v48  ;;  %v247_v51 = vadd.f32 %v581_v47, %v238_v49 }
 0x178   :  { %v248_v52 = vmax.f32 %v246_v50, 0.0  ;;  %v249_v53 = vmax.f32 %v247_v51, 0.0 }
 0x17a   :  { %v250_v54 = vpack.c.bf16 %v249_v53, %v248_v52 }
 0x17c   :  { %666 = vmatmul.mubr.bf16.vlgmr.msra.gmra.mrb[0].mxu1 %v250_v54 }
 0x24f   :  { %v349_v63 = vpop.f32.mrb[0].mxu1 }
 0x250   :  { %v667_v1 = vpop.f32.mrb[1].mxu1 }
 0x251   :  { %v352_v2 = vpop.f32.mrb[2].mxu1 }
 0x252   :  { %v356_v3 = vadd.f32 %v352_v2, %v349_v63  ;;  %v668_v4 = vpop.f32.mrb[3].mxu1 }
 0x254   :  { %v357_v5 = vrot.slane %v356_v3, 4 }
 0x256   :  { %v358_v6 = vadd.f32 %v357_v5, %v356_v3 }
 0x258   :  { %v359_v7 = vrot.slane %v358_v6, 2 }
 0x25a   :  { %v360_v8 = vadd.f32 %v359_v7, %v358_v6 }
 0x25c   :  { %v361_v9 = vrot.slane %v360_v8, 1 }
 0x25e   :  { %v362_v10 = vadd.f32 %v361_v9, %v360_v8 }
 0x260   :  { %v363_v11 = vmul.f32 0.0625, %v362_v10 }
 0x262   :  { %v364_v12 = vsub.f32 %v349_v63, %v363_v11  ;;  %v365_v13 = vsub.f32 %v352_v2, %v363_v11  ;;  %v601_v2 = vld [vmem:[%s1058_s9] ss:$0 sm:$0xff] }
 0x264   :  { %v366_v14 = vmul.f32 %v364_v12, %v364_v12  ;;  %v367_v15 = vmul.f32 %v365_v13, %v365_v13 }
 0x266   :  { %v368_v16 = vadd.f32 %v367_v15, %v366_v14 }
 0x268   :  { %v369_v0 = vrot.slane %v368_v16, 4 }
 0x26a   :  { %v370_v17 = vadd.f32 %v369_v0, %v368_v16 }
 0x26c   :  { %v371_v18 = vrot.slane %v370_v17, 2 }
 0x26e   :  { %v372_v19 = vadd.f32 %v371_v18, %v370_v17 }
 0x270   :  { %v373_v20 = vrot.slane %v372_v19, 1 }
 0x272   :  { %v374_v21 = vadd.f32 %v373_v20, %v372_v19 }
 0x274   :  { %v375_v22 = vmul.f32 0.0625, %v374_v21 }
 0x276   :  { %v376_v23 = vadd.f32 1e-05, %v375_v22 }
 0x278   :  { %727 = vrsqrt.f32 %v376_v23 }
 0x282   :  { %v728_v24 = vpop.eup %727 }
 0x283   :  { %v378_v26 = vmul.f32 %v728_v24, %v364_v12  ;;  %v379_v27 = vmul.f32 %v728_v24, %v365_v13 }
 0x285   :  { %v387_v29 = vmul.f32 %v590_v25, %v378_v26  ;;  %v388_v30 = vmul.f32 %v590_v25, %v379_v27 }
 0x287   :  { %v396_v31 = vadd.f32 %v591_v28, %v387_v29  ;;  %v397_v32 = vadd.f32 %v591_v28, %v388_v30 }
 0x289   :  { %v399_v33 = vmax.f32 %v397_v32, 0.0  ;;  %v398_v34 = vmax.f32 %v396_v31, 0.0 }
 0x28b   :  { %v400_v35 = vpack.c.bf16 %v399_v33, %v398_v34 }
 0x28d   :  { %686 = vmatmul.mubr.bf16.vlgmr.msra.gmra.mrb[4].mxu0 %v400_v35 }
 0x360   :  { %v499_v36 = vpop.f32.mrb[4].mxu0 }
 0x361   :  { %v687_v37 = vpop.f32.mrb[5].mxu0 }
 0x362   :  { %v502_v38 = vpop.f32.mrb[6].mxu0 }
 0x363   :  { %v506_v39 = vadd.f32 %v502_v38, %v499_v36  ;;  %v688_v40 = vpop.f32.mrb[7].mxu0 }
 0x365   :  { %v507_v41 = vrot.slane %v506_v39, 4 }
 0x367   :  { %v508_v42 = vadd.f32 %v507_v41, %v506_v39 }
 0x369   :  { %v509_v43 = vrot.slane %v508_v42, 2 }
 0x36b   :  { %v510_v44 = vadd.f32 %v509_v43, %v508_v42 }
 0x36d   :  { %v511_v45 = vrot.slane %v510_v44, 1 }
 0x36f   :  { %v512_v46 = vadd.f32 %v511_v45, %v510_v44 }
 0x371   :  { %v513_v47 = vmul.f32 0.0625, %v512_v46 }
 0x373   :  { %v514_v48 = vsub.f32 %v499_v36, %v513_v47  ;;  %v515_v49 = vsub.f32 %v502_v38, %v513_v47 }
 0x375   :  { %v516_v50 = vmul.f32 %v514_v48, %v514_v48  ;;  %v517_v51 = vmul.f32 %v515_v49, %v515_v49 }
 0x377   :  { %v518_v52 = vadd.f32 %v517_v51, %v516_v50 }
 0x379   :  { %v519_v53 = vrot.slane %v518_v52, 4 }
 0x37b   :  { %v520_v54 = vadd.f32 %v519_v53, %v518_v52 }
 0x37d   :  { %v521_v55 = vrot.slane %v520_v54, 2 }
 0x37f   :  { %v522_v56 = vadd.f32 %v521_v55, %v520_v54 }
 0x381   :  { %v523_v57 = vrot.slane %v522_v56, 1 }
 0x383   :  { %v524_v58 = vadd.f32 %v523_v57, %v522_v56 }
 0x385   :  { %v525_v59 = vmul.f32 0.0625, %v524_v58 }
 0x387   :  { %v526_v60 = vadd.f32 1e-05, %v525_v59 }
 0x389   :  { %729 = vrsqrt.f32 %v526_v60 }
 0x393   :  { %v730_v61 = vpop.eup %729 }
 0x394   :  { %v528_v63 = vmul.f32 %v730_v61, %v514_v48  ;;  %v529_v1 = vmul.f32 %v730_v61, %v515_v49 }
 0x396   :  { %v537_v3 = vmul.f32 %v600_v62, %v528_v63  ;;  %v538_v4 = vmul.f32 %v600_v62, %v529_v1 }
 0x398   :  { %v546_v5 = vadd.f32 %v601_v2, %v537_v3  ;;  %v547_v6 = vadd.f32 %v601_v2, %v538_v4 }
 0x39a   :  { %v548_v7 = vmax.f32 %v546_v5, 0.0  ;;  %v549_v8 = vmax.f32 %v547_v6, 0.0 }
 0x39c   :  { %550 = vst [vmem:[#allocation10] sm:$0xff] %v548_v7  ;;  %551 = vst [vmem:[#allocation10 + $0x8] sm:$0xff] %v549_v8 }
 0x39d   :  { %830 = shalt.err (!%p827_p8)
}
 0x39e   :  { %s831_s0 = scalar_lea.hbm %s1059_s10, 256 }
 0x39f   :  { %p832_p9 = scmp.ne.s32.totalorder %s1059_s10, %s831_s0  ;;  %p835_p10 = scmp.lt.u32.totalorder %s831_s0, %s1059_s10 }
 0x3a1   :  { %p837_p11 = pnand %p835_p10, %p832_p9 }
 0x3a3   :  { %840 = shalt.err (!%p837_p11)
}
 0x3a4   :  { %s858_s17 = smov 128   ;;  %s859_s18 = smov 8  }
 0x3a5   :  { %563 = dma.vmem_to_hbm [thread:$0]  %s558_s30, 256, %s1059_s10, [#allocation4], %s858_s17, %s858_s17, %s859_s18  }
 0x3a6   :  { %847 = dma.done.wait [#allocation4], 256  }
 0x3a7   :  { %848 = vsyncadd [#allocation4], 4294967040 }
 0x3a8   :  { %567 = vsyncpa [#allocation3], 1 }
 0x3a9   :  { %568 = vsyncpa [#allocation6], 1 }
 0x3aa   :  { %569 = vsyncpa [#allocation9], 1 }
 0x3ab   :  { %570 = vsyncpa [#allocation4], 1 }

</bundles_post_ra>
